<compile_context>
chip_gen: v7x
topology: tpu7x:2x2x1
jax: 0.10.0
libtpu: 0.0.40
codegen_flags: <defaults>
</compile_context>

<pallas_src>
import jax
import jax.numpy as jnp
from jax.experimental import pallas as pl
from jax.experimental.pallas import tpu as pltpu


def _dtype_matmul_kernel(x_ref, w_ref, o_ref):
    # Mirror `x.to(self.weight.dtype)` — cast the input row-tile to the weight
    # dtype (float32) inside the kernel, then matmul with f32 accumulation.
    x = x_ref[...].astype(w_ref.dtype)
    o_ref[...] = jnp.dot(x, w_ref[...], preferred_element_type=jnp.float32)


def dtype_model_forward(x, weight, *, tm=512):
    """x: (M, K) any float dtype; weight: (K, N) float32 -> (M, N) float32."""
    M, K = x.shape
    K2, N = weight.shape
    assert K == K2

    # Row-tile size: a multiple of 8 (sublane) when tiling, or the full M when
    # M is small — either way the (8, 128) block constraint is satisfied
    # because K and N equal the full array dims (3, 3).
    tm = min(tm, M)
    grid_m = pl.cdiv(M, tm)

    return pl.pallas_call(
        _dtype_matmul_kernel,
        out_shape=jax.ShapeDtypeStruct((M, N), jnp.float32),
        grid_spec=pltpu.PrefetchScalarGridSpec(
            num_scalar_prefetch=0,
            grid=(grid_m,),
            in_specs=[
                # x: one (tm, K) row tile per grid step — pipelined over M.
                pl.BlockSpec((tm, K), lambda i: (i, 0)),
                # weight: full (K, N), constant index_map -> VMEM-resident,
                # DMA'd once for the whole grid.
                pl.BlockSpec((K, N), lambda i: (0, 0)),
            ],
            out_specs=pl.BlockSpec((tm, N), lambda i: (i, 0)),
        ),
        compiler_params=pltpu.CompilerParams(
            # Row tiles are independent -> shard across TensorCores (v7x).
            dimension_semantics=("parallel",),
        ),
    )(x, weight)


if __name__ == "__main__":
    key = jax.random.PRNGKey(0)

    # Deterministic parameter init, exactly as in DTypeModel.__init__.
    weight = jnp.ones((3, 3), dtype=jnp.float32)

    # Input in a non-float32 dtype so the in-kernel cast (x.to(weight.dtype))
    # is actually exercised.  M=512 so the M-grid (tm=128 -> 4 steps) and the
    # pipelining/parallel sharding paths are exercised while staying tiny.
    M, K = 512, 3
    x = jax.random.normal(key, (M, K), dtype=jnp.float32).astype(jnp.bfloat16)

    out = dtype_model_forward(x, weight, tm=128)
    out = jax.block_until_ready(out)

    # Reference check in plain JAX (same semantics as the torch forward).
    ref = x.astype(jnp.float32) @ weight
    assert out.shape == (M, 3)
    assert out.dtype == jnp.float32
    assert jnp.allclose(out, ref, atol=1e-5, rtol=1e-5)

    print("KERNEL_OK")
</pallas_src>

<mosaic_0001>
module attributes {stable_mosaic.version = 11 : i64} {
  func.func @_dtype_matmul_kernel(%arg0: i32, %arg1: memref<128x3xbf16, #tpu.memory_space<vmem>>, %arg2: memref<3x3xf32, #tpu.memory_space<vmem>>, %arg3: memref<128x3xf32, #tpu.memory_space<vmem>>) attributes {dimension_semantics = [#tpu.dimension_semantics<parallel>], iteration_bounds = array<i64: 4>, scalar_prefetch = 0 : i64, scratch_operands = 0 : i64, tpu.core_type = #tpu.core_type<tc>, window_params = [{transform_indices = @transform_0, window_bounds = array<i64: 128, 3>}, {pipeline_mode = #tpu.pipeline_mode<synchronous>, transform_indices = @transform_1, window_bounds = array<i64: 3, 3>}, {transform_indices = @transform_2, window_bounds = array<i64: 128, 3>}]} {
    %c0 = arith.constant 0 : index
    %c0_0 = arith.constant 0 : index
    %0 = vector.load %arg1[%c0, %c0_0] : memref<128x3xbf16, #tpu.memory_space<vmem>>, vector<128x3xbf16>
    %1 = arith.extf %0 : vector<128x3xbf16> to vector<128x3xf32>
    %c0_1 = arith.constant 0 : index
    %c0_2 = arith.constant 0 : index
    %2 = vector.load %arg2[%c0_1, %c0_2] : memref<3x3xf32, #tpu.memory_space<vmem>>, vector<3x3xf32>
    %cst = arith.constant dense<0.000000e+00> : vector<128x3xf32>
    %3 = tpu.matmul %1, %2, %cst {dimension_numbers = #tpu.dot_dimension_numbers<[1], [0], [0], [1], [0, 0, 1, 1], [], []>} : vector<128x3xf32>, vector<3x3xf32>, vector<128x3xf32> -> vector<128x3xf32>
    %c0_3 = arith.constant 0 : index
    %c0_4 = arith.constant 0 : index
    %4 = vector.load %arg3[%c0_3, %c0_4] : memref<128x3xf32, #tpu.memory_space<vmem>>, vector<128x3xf32>
    tpu.vector_store %arg3[%c0_3, %c0_4], %3 {strides = array<i32>} : memref<128x3xf32, #tpu.memory_space<vmem>>, vector<128x3xf32>,
    return
  }
  func.func @transform_0(%arg0: i32) -> (i32, i32) {
    %c0_i32 = arith.constant 0 : i32
    %c0_i32_0 = arith.constant 0 : i32
    return %arg0, %c0_i32 : i32, i32
  }
  func.func @transform_1(%arg0: i32) -> (i32, i32) {
    %c0_i32 = arith.constant 0 : i32
    %c0_i32_0 = arith.constant 0 : i32
    %c0_i32_1 = arith.constant 0 : i32
    return %c0_i32, %c0_i32_0 : i32, i32
  }
  func.func @transform_2(%arg0: i32) -> (i32, i32) {
    %c0_i32 = arith.constant 0 : i32
    %c0_i32_0 = arith.constant 0 : i32
    return %arg0, %c0_i32 : i32, i32
  }
}

</mosaic_0001>

<bundles_post_ra>
// kernel: tpu_custom_call.1
= control target key start
LH: loop header
LB: loop body
LE: loop exit
PB: predicated region body
PF: predicated region fallthrough
CT: control target
= control target key end

     0   :  { %s593_s9 = smov 0   ;;  %s667_s0 = inlined_call_operand.vmem [shape: bf16[512,3], index: 0, kind: input, shape index: {}]   ;;  %s668_s1 = inlined_call_operand.vmem [shape: f32[3,3], index: 1, kind: input, shape index: {}]   ;;  %s669_s2 = inlined_call_operand.vmem [shape: f32[512,3], index: 2, kind: output, shape index: {}]  }
   0x1 LB: > { %s450_s10 = sadd.s32 4294967295, %s576_s9   ;;  %p454_p0 = scmp.ge.s32.totalorder %s576_s9, 1  ;;  %s576_s9 = sphi %s593_s9, %s12_s9  }
   0x2   : > { %p113_p1 = scmp.lt.s32.totalorder %s576_s9, 5 }
   0x4   : > { %p114_p2 = pnand %p454_p0, %p113_p1 }
   0x5   : > { %v179_v0 = vld [vmem:[%s668_s1] sm:$0x7] (!%p114_p2)  ;;  %vm229_vm0 = vcmask (!%p114_p2), 1042432   ;;  %s455_s13 = sshll.u32 (!%p114_p2), %s450_s10, 4  ;;  %vm180_vm1 = vcmask (!%p114_p2), 23552  }
   0x6   : > { %117 = sbr.rel (%p114_p2) target bundleno = 247 (0xf7), region = 28  ;;  %534 = vmatprep.subr.msk.mxu0 (!%p114_p2), %vm229_vm0, %v179_v0  ;;  %560 = vmatprep.subr.msk.mxu1 (!%p114_p2), %vm229_vm0, %v179_v0  ;;  %p136_p3 = scmp.lt.s32.totalorder (!%p114_p2), %s455_s13, 63 }
   0x7   : > { %535 = vmatpush3.msk.msra.mxu0 (!%p114_p2), %vm229_vm0, %v179_v0  ;;  %561 = vmatpush3.msk.msra.mxu1 (!%p114_p2), %vm229_vm0, %v179_v0 }
   0xd   : > { %s671_s13 = smov (!%p136_p3, %s455_s13), 63 }
   0xe   : > { %s456_s14 = sshll.u32 %s671_s13, 2  ;;  %s458_s18 = sshll.u32 %s671_s13, 3 }
   0xf   : > { %s139_s17 = scalar_lea.vmem %s667_s0, %s456_s14  ;;  %s630_s21 = scalar_lea.vmem %s669_s2, %s458_s18 }
  0x10   : > { %v479_v1 = vld [vmem:[%s139_s17] sm:$0xff]   ;;  %v510_v3 = vld [vmem:[%s139_s17 + $0x8] sm:$0xff]   ;;  %v511_v11 = vld [vmem:[%s139_s17 + $0x10] sm:$0xff]  }
  0x11   : > { %v513_v2 = vld [vmem:[%s139_s17 + $0x20] sm:$0xff]   ;;  %v480_v4 = vunpack.c.l.bf16 %v479_v1  ;;  %v481_v5 = vunpack.c.h.bf16 %v479_v1  ;;  %v514_v8 = vld [vmem:[%s139_s17 + $0x28] sm:$0xff]   ;;  %v484_v9 = vunpack.c.l.bf16 %v510_v3  ;;  %v515_v12 = vld [vmem:[%s139_s17 + $0x30] sm:$0xff]   ;;  %v485_v13 = vunpack.c.h.bf16 %v510_v3 }
  0x12   : > { %v496_v6 = vunpack.c.l.bf16 %v513_v2  ;;  %v497_v7 = vunpack.c.h.bf16 %v513_v2  ;;  %v500_v10 = vunpack.c.l.bf16 %v514_v8  ;;  %v501_v14 = vunpack.c.h.bf16 %v514_v8  ;;  %v512_v17 = vld [vmem:[%s139_s17 + $0x18] sm:$0xff]  }
  0x13   : > { %536 = vmatprep.mubr.msk.f32.mxu0 %vm180_vm1, %v480_v4  ;;  %v488_v15 = vunpack.c.l.bf16 %v511_v11  ;;  %v504_v16 = vunpack.c.l.bf16 %v515_v12  ;;  %v516_v18 = vld [vmem:[%s139_s17 + $0x38] sm:$0xff]   ;;  %v489_v19 = vunpack.c.h.bf16 %v511_v11  ;;  %v505_v20 = vunpack.c.h.bf16 %v515_v12 }
  0x14   : > { %548 = vmatprep.mubr.msk.f32.mxu1 %vm180_vm1, %v496_v6  ;;  %537 = vmatmul.mubr.msk.f32.vlgmr.msra.gmra.mrb[0].mxu0 %vm180_vm1, %v481_v5  ;;  %v492_v21 = vunpack.c.l.bf16 %v512_v17  ;;  %v508_v22 = vunpack.c.l.bf16 %v516_v18  ;;  %v493_v23 = vunpack.c.h.bf16 %v512_v17  ;;  %v509_v24 = vunpack.c.h.bf16 %v516_v18 }
  0x15   : > { %549 = vmatmul.mubr.msk.f32.vlgmr.msra.gmra.mrb[0].mxu1 %vm180_vm1, %v497_v7  ;;  %539 = vmatprep.mubr.msk.f32.mxu0 %vm180_vm1, %v484_v9 }
  0x16   : > { %551 = vmatprep.mubr.msk.f32.mxu1 %vm180_vm1, %v500_v10 }
  0x18   : > { %540 = vmatmul.mubr.msk.f32.gmra.mrb[2].mxu0 %vm180_vm1, %v485_v13 }
  0x19   : > { %552 = vmatmul.mubr.msk.f32.gmra.mrb[2].mxu1 %vm180_vm1, %v501_v14  ;;  %542 = vmatprep.mubr.msk.f32.mxu0 %vm180_vm1, %v488_v15 }
  0x1a   : > { %554 = vmatprep.mubr.msk.f32.mxu1 %vm180_vm1, %v504_v16 }
  0x1c   : > { %543 = vmatmul.mubr.msk.f32.gmra.mrb[4].mxu0 %vm180_vm1, %v489_v19 }
  0x1d   : > { %555 = vmatmul.mubr.msk.f32.gmra.mrb[4].mxu1 %vm180_vm1, %v505_v20  ;;  %545 = vmatprep.mubr.msk.f32.mxu0 %vm180_vm1, %v492_v21 }
  0x1e   : > { %557 = vmatprep.mubr.msk.f32.mxu1 %vm180_vm1, %v508_v22 }
  0x20   : > { %546 = vmatmul.mubr.msk.f32.gmra.mrb[6].mxu0 %vm180_vm1, %v493_v23 }
  0x21   : > { %558 = vmatmul.mubr.msk.f32.gmra.mrb[6].mxu1 %vm180_vm1, %v509_v24 }
  0xe7   : > { %v538_v25 = vpop.f32.mrb[0].mxu0 }
  0xe8   : > { %v550_v26 = vpop.f32.mrb[0].mxu1  ;;  %379 = vst.msk [vmem:[%s630_s21 + $0x8] sm:$0xff] %vm180_vm1, %v538_v25  ;;  %v299_v27 = vpop.f32.mrb[1].mxu0 }
  0xe9   : > { %387 = vst.msk [vmem:[%s630_s21 + $0x48] sm:$0xff] %vm180_vm1, %v550_v26  ;;  %v339_v28 = vpop.f32.mrb[1].mxu1  ;;  %378 = vst.msk [vmem:[%s630_s21] sm:$0xff] %vm180_vm1, %v299_v27 }
  0xea   : > { %386 = vst.msk [vmem:[%s630_s21 + $0x40] sm:$0xff] %vm180_vm1, %v339_v28 }
  0xeb   : > { %v541_v29 = vpop.f32.mrb[2].mxu0 }
  0xec   : > { %v553_v30 = vpop.f32.mrb[2].mxu1  ;;  %381 = vst.msk [vmem:[%s630_s21 + $0x18] sm:$0xff] %vm180_vm1, %v541_v29  ;;  %v309_v31 = vpop.f32.mrb[3].mxu0 }
  0xed   : > { %389 = vst.msk [vmem:[%s630_s21 + $0x58] sm:$0xff] %vm180_vm1, %v553_v30  ;;  %v349_v32 = vpop.f32.mrb[3].mxu1  ;;  %380 = vst.msk [vmem:[%s630_s21 + $0x10] sm:$0xff] %vm180_vm1, %v309_v31 }
  0xee   : > { %388 = vst.msk [vmem:[%s630_s21 + $0x50] sm:$0xff] %vm180_vm1, %v349_v32 }
  0xef   : > { %v544_v33 = vpop.f32.mrb[4].mxu0 }
  0xf0   : > { %v556_v34 = vpop.f32.mrb[4].mxu1  ;;  %383 = vst.msk [vmem:[%s630_s21 + $0x28] sm:$0xff] %vm180_vm1, %v544_v33  ;;  %v319_v35 = vpop.f32.mrb[5].mxu0 }
  0xf1   : > { %391 = vst.msk [vmem:[%s630_s21 + $0x68] sm:$0xff] %vm180_vm1, %v556_v34  ;;  %v359_v36 = vpop.f32.mrb[5].mxu1  ;;  %382 = vst.msk [vmem:[%s630_s21 + $0x20] sm:$0xff] %vm180_vm1, %v319_v35 }
  0xf2   : > { %390 = vst.msk [vmem:[%s630_s21 + $0x60] sm:$0xff] %vm180_vm1, %v359_v36 }
  0xf3   : > { %v547_v37 = vpop.f32.mrb[6].mxu0 }
  0xf4   : > { %v559_v38 = vpop.f32.mrb[6].mxu1  ;;  %385 = vst.msk [vmem:[%s630_s21 + $0x38] sm:$0xff] %vm180_vm1, %v547_v37  ;;  %v329_v39 = vpop.f32.mrb[7].mxu0 }
  0xf5   : > { %393 = vst.msk [vmem:[%s630_s21 + $0x78] sm:$0xff] %vm180_vm1, %v559_v38  ;;  %v369_v40 = vpop.f32.mrb[7].mxu1  ;;  %384 = vst.msk [vmem:[%s630_s21 + $0x30] sm:$0xff] %vm180_vm1, %v329_v39 }
  0xf6   : > { %392 = vst.msk [vmem:[%s630_s21 + $0x70] sm:$0xff] %vm180_vm1, %v369_v40 }
  0xf7 PF: > { %s12_s9 = sadd.s32 1, %s576_s9  }
  0xf8   : > { %p9_p4 = scmp.ge.s32.totalorder %s12_s9, 6  }
  0xfa   :  { %11 = sbr.rel (!%p9_p4) target bundleno = 1 (0x1), region = 58 }

</bundles_post_ra>
